<compile_context>
chip_gen: v7x
topology: tpu7x:2x2x1
jax: 0.10.0
libtpu: 0.0.40
codegen_flags: <defaults>
</compile_context>

<pallas_src>
import numpy as np
import jax
import jax.numpy as jnp
from jax.experimental import pallas as pl
from jax.experimental.pallas import tpu as pltpu


def _round_up(x, m):
    return ((x + m - 1) // m) * m


def _vmem_capacity_bytes():
    """Per-core VMEM capacity; conservative 64 MiB (v7x per-core) fallback."""
    try:
        cap = int(getattr(pltpu.get_tpu_info(), "vmem_capacity_bytes", 0))
        if cap > 0:
            return cap
    except Exception:
        pass
    return 64 << 20


# Generous bound on simultaneously-live f32 temporaries per (class, lane)
# element inside the bin loop (probs, d, one-hot, prev/cur masks, selects).
_LIVE_F32_PER_ELEM = 10


def _choose_tn(n_samples, num_classes, vmem_cap, block_n=None):
    """C-aware lane-tile size (multiple of 128, or the full N if it fits)."""
    if block_n is not None:
        tn_cap = max(128, _round_up(int(block_n), 128))
    else:
        # Budget ~half of per-core VMEM (capped at 48 MiB) across the
        # double-buffered inputs (2*(C+1) f32 per lane) and the in-kernel
        # temporaries (~_LIVE_F32_PER_ELEM * C f32 per lane).
        budget = min(vmem_cap // 2, 48 << 20)
        per_lane_bytes = 4 * (2 * (num_classes + 1)
                              + _LIVE_F32_PER_ELEM * num_classes)
        tn_cap = max(128, (budget // per_lane_bytes) // 128 * 128)
    if n_samples <= tn_cap:
        # Single block along lanes; a block dim equal to the full array dim
        # needs no 128-alignment.
        return n_samples
    return tn_cap


def _make_classwise_ece_kernel(n_valid, num_classes, n_bins, bounds, tn,
                               tiles_per_split):
    """bounds: static python list of n_bins+1 float boundaries."""

    def kernel(logits_ref, labels_ref, out_ref, acc_ref):
        p = pl.program_id(0)          # core-split axis ("parallel")
        i = pl.program_id(1)          # tile axis over samples ("arbitrary")

        @pl.when(i == 0)
        def _init():
            acc_ref[...] = jnp.zeros_like(acc_ref)

        logits = logits_ref[...]      # [C, TN] f32 (classes on sublanes)
        labels = labels_ref[...]      # [1, TN] i32 (lane-dense)

        # Numerically stable softmax over classes (sublane axis).  One exact
        # reciprocal per column instead of C*TN divides (<=1-ulp deviation
        # from the reference's per-element divide).
        m = jnp.max(logits, axis=0, keepdims=True)
        e = jnp.exp(logits - m)
        inv = 1.0 / jnp.sum(e, axis=0, keepdims=True)            # [1, TN]
        probs = e * inv                                          # [C, TN]

        # One-hot correctness via broadcast compare against a sublane iota.
        class_iota = jax.lax.broadcasted_iota(jnp.int32, (num_classes, tn), 0)
        correct = (labels == class_iota).astype(jnp.float32)     # [C, TN]

        # Zero invalid lanes once: covers the ragged trailing block (no host
        # pad) and clamped duplicate tail tiles of the core split.  Every bin
        # contribution from an invalid lane is then exactly zero.
        lane_iota = jax.lax.broadcasted_iota(jnp.int32, (1, tn), 1)
        tile = p * tiles_per_split + i
        valid = (tile * tn + lane_iota) < n_valid                # [1, TN]
        d = jnp.where(valid, probs - correct, 0.0)               # [C, TN]

        # Rolling boundary masks: only two [C, TN] masks live at a time.  The
        # probs > 1.0 boundary is dropped (always false after softmax), so
        # the last bin is just `prev`.
        bin_iota = jax.lax.broadcasted_iota(jnp.int32, (1, n_bins), 1)
        partial = jnp.zeros((num_classes, n_bins), jnp.float32)
        prev = probs > bounds[0]
        for b in range(n_bins):
            if b + 1 < n_bins:
                cur = probs > bounds[b + 1]
                # (lo, up] semantics: probs > lo AND NOT probs > up
                in_bin = jnp.logical_and(prev, jnp.logical_not(cur))
                prev = cur
            else:
                in_bin = prev
            s = jnp.sum(jnp.where(in_bin, d, 0.0),
                        axis=1, keepdims=True)                   # [C, 1]
            # Pack the per-bin column into the [C, n_bins] partial with a
            # pure-elementwise bin-iota select (no narrow concatenates, no
            # width-1 stores).
            partial = partial + jnp.where(bin_iota == b, s, 0.0)

        # Single full-block accumulator update per tile.
        acc_ref[...] += partial

        @pl.when(i == pl.num_programs(1) - 1)
        def _finalize():
            # Emit this split's signed per-(class, bin) sums; abs() and the
            # 1/(N*C) normalization are applied after the cross-split sum in
            # the wrapper (identical math; empty bins contribute 0).
            out_ref[...] = acc_ref[...][None, :, :]

    return kernel


def classwise_ece(logits, labels, num_classes, n_bins=10, block_n=None,
                  num_core_splits=2):
    """Pallas TPU implementation of ClasswiseECELoss.forward.

    logits: [N, C] float, labels: [N] int.  Returns shape-(1,) float32.
    block_n: optional override of the lane-tile size (rounded up to 128);
    default is a C-aware multi-MiB tile derived from per-core VMEM capacity.
    """
    n_samples, c = logits.shape
    assert c == num_classes
    # Same boundaries as torch.linspace(0, 1, n_bins + 1) in float32.
    bounds = [float(v) for v in
              np.linspace(0.0, 1.0, n_bins + 1, dtype=np.float32)]

    # Lane-dense transposed layout: classes -> sublanes, samples -> lanes.
    # TODO(synk): eliminate this host-side transpose (an extra HBM read+write
    # of the [N, C] array outside the kernel) via an in-kernel (TM, C) ->
    # (C, TM) transpose once the narrow-minor-dim Mosaic transpose path is
    # validated on all target generations.
    logits_t = jnp.asarray(logits, jnp.float32).T                # [C, N]
    labels_row = jnp.asarray(labels, jnp.int32).reshape(1, n_samples)

    vmem_cap = _vmem_capacity_bytes()
    tn = _choose_tn(n_samples, num_classes, vmem_cap, block_n)
    # No host-side pad: ragged trailing block is handled by the valid mask.
    n_tiles = pl.cdiv(n_samples, tn)

    # v7x: shard the tiles across the two TensorCores via a leading
    # "parallel" grid axis; on 1-TC chips the axis just runs sequentially.
    num_splits = max(1, min(int(num_core_splits), n_tiles))
    tiles_per_split = pl.cdiv(n_tiles, num_splits)
    last_tile = n_tiles - 1

    def data_idx(sp, it):
        # Clamp so duplicated tail tiles never issue an out-of-bounds DMA;
        # their lanes are zeroed by the in-kernel valid mask anyway.
        return (0, jnp.minimum(sp * tiles_per_split + it, last_tile))

    kernel = _make_classwise_ece_kernel(n_samples, num_classes, n_bins,
                                        bounds, tn, tiles_per_split)

    # Raise the scoped-VMEM limit so the large double-buffered tiles compile
    # on v5e (16 MiB default) while staying inside v7x's 64 MiB per-core VMEM.
    vmem_limit = int(min(vmem_cap * 3 // 4, 96 << 20))

    partials = pl.pallas_call(
        kernel,
        out_shape=jax.ShapeDtypeStruct((num_splits, c, n_bins), jnp.float32),
        grid_spec=pltpu.PrefetchScalarGridSpec(
            num_scalar_prefetch=0,
            grid=(num_splits, tiles_per_split),
            in_specs=[
                pl.BlockSpec((c, tn), data_idx),      # logits_t tile
                pl.BlockSpec((1, tn), data_idx),      # labels tile
            ],
            out_specs=pl.BlockSpec((1, c, n_bins), lambda sp, it: (sp, 0, 0)),
            scratch_shapes=[pltpu.VMEM((c, n_bins), jnp.float32)],
        ),
        compiler_params=pltpu.CompilerParams(
            dimension_semantics=("parallel", "arbitrary"),
            vmem_limit_bytes=vmem_limit),
    )(logits_t, labels_row)

    # class_sce[c] = sum_b |S[c, b]| / N ; result = mean over classes.
    # NOTE: abs() is applied only after summing the signed partials across
    # the core splits (required for correctness of the split).
    signed = jnp.sum(partials, axis=0)                # [C, n_bins]
    sce = jnp.sum(jnp.abs(signed)) / jnp.float32(num_classes * n_samples)
    return jnp.reshape(sce, (1,))                     # matches torch .view(-1)


def _reference_numpy(logits, labels, num_classes, n_bins=10):
    """Pure-numpy transcription of the PyTorch module, for verification."""
    logits = np.asarray(logits, dtype=np.float32)
    labels = np.asarray(labels)
    e = np.exp(logits - logits.max(axis=1, keepdims=True))
    softmaxes = e / e.sum(axis=1, keepdims=True)
    bounds = np.linspace(0.0, 1.0, n_bins + 1, dtype=np.float32)
    per_class = []
    for i in range(num_classes):
        conf = softmaxes[:, i]
        in_class = labels == i
        sce = 0.0
        for lo, up in zip(bounds[:-1], bounds[1:]):
            in_bin = (conf > lo) & (conf <= up)
            prop = in_bin.mean()
            if prop > 0:
                acc = in_class[in_bin].astype(np.float32).mean()
                avg_conf = conf[in_bin].mean()
                sce += abs(avg_conf - acc) * prop
        per_class.append(sce)
    return np.array([np.mean(per_class)], dtype=np.float32)


if __name__ == "__main__":
    key = jax.random.PRNGKey(0)
    k1, k2, k3, k4 = jax.random.split(key, 4)

    # Small demo config (matches module semantics: [N, C] logits, [N] labels).
    num_classes = 8
    n_samples = 16
    n_bins = 10
    logits = jax.random.normal(k1, (n_samples, num_classes), dtype=jnp.float32)
    labels = jax.random.randint(k2, (n_samples,), 0, num_classes,
                                dtype=jnp.int32)

    out = jax.block_until_ready(
        classwise_ece(logits, labels, num_classes, n_bins=n_bins))
    ref = _reference_numpy(np.asarray(logits), np.asarray(labels),
                           num_classes, n_bins=n_bins)
    np.testing.assert_allclose(np.asarray(out), ref, rtol=2e-5, atol=2e-6)

    # Second config: non-multiple-of-128 N with small forced tiles exercises
    # multi-tile accumulation, the ragged trailing block (no host pad), and
    # the 2-way core-split grid with a clamped duplicate tail tile.
    n2, c2 = 300, 5
    logits2 = jax.random.normal(k3, (n2, c2), dtype=jnp.float32)
    labels2 = jax.random.randint(k4, (n2,), 0, c2, dtype=jnp.int32)
    out2 = jax.block_until_ready(
        classwise_ece(logits2, labels2, c2, n_bins=n_bins, block_n=128))
    ref2 = _reference_numpy(np.asarray(logits2), np.asarray(labels2),
                            c2, n_bins=n_bins)
    np.testing.assert_allclose(np.asarray(out2), ref2, rtol=2e-5, atol=2e-6)

    print("KERNEL_OK")
</pallas_src>

<mosaic_0001>
module attributes {stable_mosaic.version = 11 : i64} {
  func.func @kernel(%arg0: i32, %arg1: i32, %arg2: memref<8x16xf32, #tpu.memory_space<vmem>>, %arg3: memref<1x16xi32, #tpu.memory_space<vmem>>, %arg4: memref<1x8x10xf32, #tpu.memory_space<vmem>>, %arg5: memref<8x10xf32, #tpu.memory_space<vmem>>) attributes {dimension_semantics = [#tpu.dimension_semantics<parallel>, #tpu.dimension_semantics<arbitrary>], iteration_bounds = array<i64: 1, 1>, scalar_prefetch = 0 : i64, scratch_operands = 1 : i64, tpu.core_type = #tpu.core_type<tc>, window_params = [{transform_indices = @transform_0, window_bounds = array<i64: 8, 16>}, {transform_indices = @transform_1, window_bounds = array<i64: 1, 16>}, {transform_indices = @transform_2, window_bounds = array<i64: 1, 8, 10>}]} {
    %c0_i32 = arith.constant 0 : i32
    %0 = arith.cmpi eq, %arg1, %c0_i32 : i32
    %1 = arith.extui %0 : i1 to i32
    %c0_i32_0 = arith.constant 0 : i32
    %2 = arith.cmpi ne, %1, %c0_i32_0 : i32
    scf.if %2 {
      %cst_66 = arith.constant 0.000000e+00 : f32
      %210 = vector.broadcast %cst_66 : f32 to vector<8x10xf32>
      %c0_67 = arith.constant 0 : index
      %c0_68 = arith.constant 0 : index
      %211 = vector.load %arg5[%c0_67, %c0_68] : memref<8x10xf32, #tpu.memory_space<vmem>>, vector<8x10xf32>
      tpu.vector_store %arg5[%c0_67, %c0_68], %210 {strides = array<i32>} : memref<8x10xf32, #tpu.memory_space<vmem>>, vector<8x10xf32>,
    } else {
    }
    %c0 = arith.constant 0 : index
    %c0_1 = arith.constant 0 : index
    %3 = vector.load %arg2[%c0, %c0_1] : memref<8x16xf32, #tpu.memory_space<vmem>>, vector<8x16xf32>
    %c0_2 = arith.constant 0 : index
    %c0_3 = arith.constant 0 : index
    %4 = vector.load %arg3[%c0_2, %c0_3] : memref<1x16xi32, #tpu.memory_space<vmem>>, vector<1x16xi32>
    %cst = arith.constant dense<0xFF800000> : vector<16xf32>
    %5 = vector.multi_reduction <maximumf>, %3, %cst [0] : vector<8x16xf32> to vector<16xf32>
    %6 = vector.shape_cast %5 : vector<16xf32> to vector<1x16xf32>
    %7 = vector.broadcast %6 : vector<1x16xf32> to vector<8x16xf32>
    %8 = arith.subf %3, %7 : vector<8x16xf32>
    %9 = math.exp %8 : vector<8x16xf32>
    %cst_4 = arith.constant dense<0.000000e+00> : vector<16xf32>
    %10 = vector.multi_reduction <add>, %9, %cst_4 [0] : vector<8x16xf32> to vector<16xf32>
    %11 = vector.shape_cast %10 : vector<16xf32> to vector<1x16xf32>
    %cst_5 = arith.constant 1.000000e+00 : f32
    %12 = vector.broadcast %cst_5 : f32 to vector<1x16xf32>
    %13 = arith.divf %12, %11 : vector<1x16xf32>
    %14 = vector.broadcast %13 : vector<1x16xf32> to vector<8x16xf32>
    %15 = arith.mulf %9, %14 : vector<8x16xf32>
    %16 = tpu.iota {dimensions = array<i32: 0>} : vector<8x16xi32>
    %17 = vector.broadcast %4 : vector<1x16xi32> to vector<8x16xi32>
    %18 = arith.cmpi eq, %17, %16 : vector<8x16xi32>
    %19 = arith.extui %18 : vector<8x16xi1> to vector<8x16xi32>
    %20 = arith.sitofp %19 : vector<8x16xi32> to vector<8x16xf32>
    %21 = tpu.iota {dimensions = array<i32: 1>} : vector<1x16xi32>
    %c1_i32 = arith.constant 1 : i32
    %22 = arith.muli %arg0, %c1_i32 : i32
    %23 = arith.addi %22, %arg1 : i32
    %c16_i32 = arith.constant 16 : i32
    %24 = arith.muli %23, %c16_i32 : i32
    %25 = vector.broadcast %24 : i32 to vector<1x16xi32>
    %26 = arith.addi %25, %21 : vector<1x16xi32>
    %c16_i32_6 = arith.constant 16 : i32
    %27 = vector.broadcast %c16_i32_6 : i32 to vector<1x16xi32>
    %28 = arith.cmpi slt, %26, %27 : vector<1x16xi32>
    %29 = arith.subf %15, %20 : vector<8x16xf32>
    %cst_7 = arith.constant 0.000000e+00 : f32
    %30 = vector.shape_cast %28 : vector<1x16xi1> to vector<1x16xi1>
    %31 = vector.broadcast %30 : vector<1x16xi1> to vector<8x16xi1>
    %32 = vector.broadcast %cst_7 : f32 to vector<8x16xf32>
    %33 = arith.select %31, %29, %32 : vector<8x16xi1>, vector<8x16xf32>
    %34 = tpu.iota {dimensions = array<i32: 1>} : vector<1x10xi32>
    %cst_8 = arith.constant 0.000000e+00 : f32
    %35 = vector.broadcast %cst_8 : f32 to vector<8x10xf32>
    %cst_9 = arith.constant 0.000000e+00 : f32
    %36 = vector.broadcast %cst_9 : f32 to vector<8x16xf32>
    %37 = arith.cmpf ogt, %15, %36 : vector<8x16xf32>
    %cst_10 = arith.constant 1.000000e-01 : f32
    %38 = vector.broadcast %cst_10 : f32 to vector<8x16xf32>
    %39 = arith.cmpf ogt, %15, %38 : vector<8x16xf32>
    %cst_11 = arith.constant dense<true> : vector<8x16xi1>
    %40 = arith.xori %39, %cst_11 : vector<8x16xi1>
    %41 = arith.andi %37, %40 : vector<8x16xi1>
    %cst_12 = arith.constant 0.000000e+00 : f32
    %42 = vector.broadcast %cst_12 : f32 to vector<8x16xf32>
    %43 = arith.select %41, %33, %42 : vector<8x16xi1>, vector<8x16xf32>
    %cst_13 = arith.constant dense<0.000000e+00> : vector<8xf32>
    %44 = vector.multi_reduction <add>, %43, %cst_13 [1] : vector<8x16xf32> to vector<8xf32>
    %45 = vector.shape_cast %44 : vector<8xf32> to vector<8x1xf32>
    %c0_i32_14 = arith.constant 0 : i32
    %46 = vector.broadcast %c0_i32_14 : i32 to vector<1x10xi32>
    %47 = arith.cmpi eq, %34, %46 : vector<1x10xi32>
    %cst_15 = arith.constant 0.000000e+00 : f32
    %48 = vector.shape_cast %47 : vector<1x10xi1> to vector<1x10xi1>
    %49 = vector.broadcast %48 : vector<1x10xi1> to vector<8x10xi1>
    %50 = vector.shape_cast %45 : vector<8x1xf32> to vector<8x1xf32>
    %51 = vector.broadcast %50 : vector<8x1xf32> to vector<8x10xf32>
    %52 = vector.broadcast %cst_15 : f32 to vector<8x10xf32>
    %53 = arith.select %49, %51, %52 : vector<8x10xi1>, vector<8x10xf32>
    %54 = arith.addf %35, %53 : vector<8x10xf32>
    %cst_16 = arith.constant 2.000000e-01 : f32
    %55 = vector.broadcast %cst_16 : f32 to vector<8x16xf32>
    %56 = arith.cmpf ogt, %15, %55 : vector<8x16xf32>
    %cst_17 = arith.constant dense<true> : vector<8x16xi1>
    %57 = arith.xori %56, %cst_17 : vector<8x16xi1>
    %58 = arith.andi %39, %57 : vector<8x16xi1>
    %cst_18 = arith.constant 0.000000e+00 : f32
    %59 = vector.broadcast %cst_18 : f32 to vector<8x16xf32>
    %60 = arith.select %58, %33, %59 : vector<8x16xi1>, vector<8x16xf32>
    %cst_19 = arith.constant dense<0.000000e+00> : vector<8xf32>
    %61 = vector.multi_reduction <add>, %60, %cst_19 [1] : vector<8x16xf32> to vector<8xf32>
    %62 = vector.shape_cast %61 : vector<8xf32> to vector<8x1xf32>
    %c1_i32_20 = arith.constant 1 : i32
    %63 = vector.broadcast %c1_i32_20 : i32 to vector<1x10xi32>
    %64 = arith.cmpi eq, %34, %63 : vector<1x10xi32>
    %cst_21 = arith.constant 0.000000e+00 : f32
    %65 = vector.shape_cast %64 : vector<1x10xi1> to vector<1x10xi1>
    %66 = vector.broadcast %65 : vector<1x10xi1> to vector<8x10xi1>
    %67 = vector.shape_cast %62 : vector<8x1xf32> to vector<8x1xf32>
    %68 = vector.broadcast %67 : vector<8x1xf32> to vector<8x10xf32>
    %69 = vector.broadcast %cst_21 : f32 to vector<8x10xf32>
    %70 = arith.select %66, %68, %69 : vector<8x10xi1>, vector<8x10xf32>
    %71 = arith.addf %54, %70 : vector<8x10xf32>
    %cst_22 = arith.constant 3.000000e-01 : f32
    %72 = vector.broadcast %cst_22 : f32 to vector<8x16xf32>
    %73 = arith.cmpf ogt, %15, %72 : vector<8x16xf32>
    %cst_23 = arith.constant dense<true> : vector<8x16xi1>
    %74 = arith.xori %73, %cst_23 : vector<8x16xi1>
    %75 = arith.andi %56, %74 : vector<8x16xi1>
    %cst_24 = arith.constant 0.000000e+00 : f32
    %76 = vector.broadcast %cst_24 : f32 to vector<8x16xf32>
    %77 = arith.select %75, %33, %76 : vector<8x16xi1>, vector<8x16xf32>
    %cst_25 = arith.constant dense<0.000000e+00> : vector<8xf32>
    %78 = vector.multi_reduction <add>, %77, %cst_25 [1] : vector<8x16xf32> to vector<8xf32>
    %79 = vector.shape_cast %78 : vector<8xf32> to vector<8x1xf32>
    %c2_i32 = arith.constant 2 : i32
    %80 = vector.broadcast %c2_i32 : i32 to vector<1x10xi32>
    %81 = arith.cmpi eq, %34, %80 : vector<1x10xi32>
    %cst_26 = arith.constant 0.000000e+00 : f32
    %82 = vector.shape_cast %81 : vector<1x10xi1> to vector<1x10xi1>
    %83 = vector.broadcast %82 : vector<1x10xi1> to vector<8x10xi1>
    %84 = vector.shape_cast %79 : vector<8x1xf32> to vector<8x1xf32>
    %85 = vector.broadcast %84 : vector<8x1xf32> to vector<8x10xf32>
    %86 = vector.broadcast %cst_26 : f32 to vector<8x10xf32>
    %87 = arith.select %83, %85, %86 : vector<8x10xi1>, vector<8x10xf32>
    %88 = arith.addf %71, %87 : vector<8x10xf32>
    %cst_27 = arith.constant 4.000000e-01 : f32
    %89 = vector.broadcast %cst_27 : f32 to vector<8x16xf32>
    %90 = arith.cmpf ogt, %15, %89 : vector<8x16xf32>
    %cst_28 = arith.constant dense<true> : vector<8x16xi1>
    %91 = arith.xori %90, %cst_28 : vector<8x16xi1>
    %92 = arith.andi %73, %91 : vector<8x16xi1>
    %cst_29 = arith.constant 0.000000e+00 : f32
    %93 = vector.broadcast %cst_29 : f32 to vector<8x16xf32>
    %94 = arith.select %92, %33, %93 : vector<8x16xi1>, vector<8x16xf32>
    %cst_30 = arith.constant dense<0.000000e+00> : vector<8xf32>
    %95 = vector.multi_reduction <add>, %94, %cst_30 [1] : vector<8x16xf32> to vector<8xf32>
    %96 = vector.shape_cast %95 : vector<8xf32> to vector<8x1xf32>
    %c3_i32 = arith.constant 3 : i32
    %97 = vector.broadcast %c3_i32 : i32 to vector<1x10xi32>
    %98 = arith.cmpi eq, %34, %97 : vector<1x10xi32>
    %cst_31 = arith.constant 0.000000e+00 : f32
    %99 = vector.shape_cast %98 : vector<1x10xi1> to vector<1x10xi1>
    %100 = vector.broadcast %99 : vector<1x10xi1> to vector<8x10xi1>
    %101 = vector.shape_cast %96 : vector<8x1xf32> to vector<8x1xf32>
    %102 = vector.broadcast %101 : vector<8x1xf32> to vector<8x10xf32>
    %103 = vector.broadcast %cst_31 : f32 to vector<8x10xf32>
    %104 = arith.select %100, %102, %103 : vector<8x10xi1>, vector<8x10xf32>
    %105 = arith.addf %88, %104 : vector<8x10xf32>
    %cst_32 = arith.constant 5.000000e-01 : f32
    %106 = vector.broadcast %cst_32 : f32 to vector<8x16xf32>
    %107 = arith.cmpf ogt, %15, %106 : vector<8x16xf32>
    %cst_33 = arith.constant dense<true> : vector<8x16xi1>
    %108 = arith.xori %107, %cst_33 : vector<8x16xi1>
    %109 = arith.andi %90, %108 : vector<8x16xi1>
    %cst_34 = arith.constant 0.000000e+00 : f32
    %110 = vector.broadcast %cst_34 : f32 to vector<8x16xf32>
    %111 = arith.select %109, %33, %110 : vector<8x16xi1>, vector<8x16xf32>
    %cst_35 = arith.constant dense<0.000000e+00> : vector<8xf32>
    %112 = vector.multi_reduction <add>, %111, %cst_35 [1] : vector<8x16xf32> to vector<8xf32>
    %113 = vector.shape_cast %112 : vector<8xf32> to vector<8x1xf32>
    %c4_i32 = arith.constant 4 : i32
    %114 = vector.broadcast %c4_i32 : i32 to vector<1x10xi32>
    %115 = arith.cmpi eq, %34, %114 : vector<1x10xi32>
    %cst_36 = arith.constant 0.000000e+00 : f32
    %116 = vector.shape_cast %115 : vector<1x10xi1> to vector<1x10xi1>
    %117 = vector.broadcast %116 : vector<1x10xi1> to vector<8x10xi1>
    %118 = vector.shape_cast %113 : vector<8x1xf32> to vector<8x1xf32>
    %119 = vector.broadcast %118 : vector<8x1xf32> to vector<8x10xf32>
    %120 = vector.broadcast %cst_36 : f32 to vector<8x10xf32>
    %121 = arith.select %117, %119, %120 : vector<8x10xi1>, vector<8x10xf32>
    %122 = arith.addf %105, %121 : vector<8x10xf32>
    %cst_37 = arith.constant 6.000000e-01 : f32
    %123 = vector.broadcast %cst_37 : f32 to vector<8x16xf32>
    %124 = arith.cmpf ogt, %15, %123 : vector<8x16xf32>
    %cst_38 = arith.constant dense<true> : vector<8x16xi1>
    %125 = arith.xori %124, %cst_38 : vector<8x16xi1>
    %126 = arith.andi %107, %125 : vector<8x16xi1>
    %cst_39 = arith.constant 0.000000e+00 : f32
    %127 = vector.broadcast %cst_39 : f32 to vector<8x16xf32>
    %128 = arith.select %126, %33, %127 : vector<8x16xi1>, vector<8x16xf32>
    %cst_40 = arith.constant dense<0.000000e+00> : vector<8xf32>
    %129 = vector.multi_reduction <add>, %128, %cst_40 [1] : vector<8x16xf32> to vector<8xf32>
    %130 = vector.shape_cast %129 : vector<8xf32> to vector<8x1xf32>
    %c5_i32 = arith.constant 5 : i32
    %131 = vector.broadcast %c5_i32 : i32 to vector<1x10xi32>
    %132 = arith.cmpi eq, %34, %131 : vector<1x10xi32>
    %cst_41 = arith.constant 0.000000e+00 : f32
    %133 = vector.shape_cast %132 : vector<1x10xi1> to vector<1x10xi1>
    %134 = vector.broadcast %133 : vector<1x10xi1> to vector<8x10xi1>
    %135 = vector.shape_cast %130 : vector<8x1xf32> to vector<8x1xf32>
    %136 = vector.broadcast %135 : vector<8x1xf32> to vector<8x10xf32>
    %137 = vector.broadcast %cst_41 : f32 to vector<8x10xf32>
    %138 = arith.select %134, %136, %137 : vector<8x10xi1>, vector<8x10xf32>
    %139 = arith.addf %122, %138 : vector<8x10xf32>
    %cst_42 = arith.constant 0.699999988 : f32
    %140 = vector.broadcast %cst_42 : f32 to vector<8x16xf32>
    %141 = arith.cmpf ogt, %15, %140 : vector<8x16xf32>
    %cst_43 = arith.constant dense<true> : vector<8x16xi1>
    %142 = arith.xori %141, %cst_43 : vector<8x16xi1>
    %143 = arith.andi %124, %142 : vector<8x16xi1>
    %cst_44 = arith.constant 0.000000e+00 : f32
    %144 = vector.broadcast %cst_44 : f32 to vector<8x16xf32>
    %145 = arith.select %143, %33, %144 : vector<8x16xi1>, vector<8x16xf32>
    %cst_45 = arith.constant dense<0.000000e+00> : vector<8xf32>
    %146 = vector.multi_reduction <add>, %145, %cst_45 [1] : vector<8x16xf32> to vector<8xf32>
    %147 = vector.shape_cast %146 : vector<8xf32> to vector<8x1xf32>
    %c6_i32 = arith.constant 6 : i32
    %148 = vector.broadcast %c6_i32 : i32 to vector<1x10xi32>
    %149 = arith.cmpi eq, %34, %148 : vector<1x10xi32>
    %cst_46 = arith.constant 0.000000e+00 : f32
    %150 = vector.shape_cast %149 : vector<1x10xi1> to vector<1x10xi1>
    %151 = vector.broadcast %150 : vector<1x10xi1> to vector<8x10xi1>
    %152 = vector.shape_cast %147 : vector<8x1xf32> to vector<8x1xf32>
    %153 = vector.broadcast %152 : vector<8x1xf32> to vector<8x10xf32>
    %154 = vector.broadcast %cst_46 : f32 to vector<8x10xf32>
    %155 = arith.select %151, %153, %154 : vector<8x10xi1>, vector<8x10xf32>
    %156 = arith.addf %139, %155 : vector<8x10xf32>
    %cst_47 = arith.constant 8.000000e-01 : f32
    %157 = vector.broadcast %cst_47 : f32 to vector<8x16xf32>
    %158 = arith.cmpf ogt, %15, %157 : vector<8x16xf32>
    %cst_48 = arith.constant dense<true> : vector<8x16xi1>
    %159 = arith.xori %158, %cst_48 : vector<8x16xi1>
    %160 = arith.andi %141, %159 : vector<8x16xi1>
    %cst_49 = arith.constant 0.000000e+00 : f32
    %161 = vector.broadcast %cst_49 : f32 to vector<8x16xf32>
    %162 = arith.select %160, %33, %161 : vector<8x16xi1>, vector<8x16xf32>
    %cst_50 = arith.constant dense<0.000000e+00> : vector<8xf32>
    %163 = vector.multi_reduction <add>, %162, %cst_50 [1] : vector<8x16xf32> to vector<8xf32>
    %164 = vector.shape_cast %163 : vector<8xf32> to vector<8x1xf32>
    %c7_i32 = arith.constant 7 : i32
    %165 = vector.broadcast %c7_i32 : i32 to vector<1x10xi32>
    %166 = arith.cmpi eq, %34, %165 : vector<1x10xi32>
    %cst_51 = arith.constant 0.000000e+00 : f32
    %167 = vector.shape_cast %166 : vector<1x10xi1> to vector<1x10xi1>
    %168 = vector.broadcast %167 : vector<1x10xi1> to vector<8x10xi1>
    %169 = vector.shape_cast %164 : vector<8x1xf32> to vector<8x1xf32>
    %170 = vector.broadcast %169 : vector<8x1xf32> to vector<8x10xf32>
    %171 = vector.broadcast %cst_51 : f32 to vector<8x10xf32>
    %172 = arith.select %168, %170, %171 : vector<8x10xi1>, vector<8x10xf32>
    %173 = arith.addf %156, %172 : vector<8x10xf32>
    %cst_52 = arith.constant 0.899999976 : f32
    %174 = vector.broadcast %cst_52 : f32 to vector<8x16xf32>
    %175 = arith.cmpf ogt, %15, %174 : vector<8x16xf32>
    %cst_53 = arith.constant dense<true> : vector<8x16xi1>
    %176 = arith.xori %175, %cst_53 : vector<8x16xi1>
    %177 = arith.andi %158, %176 : vector<8x16xi1>
    %cst_54 = arith.constant 0.000000e+00 : f32
    %178 = vector.broadcast %cst_54 : f32 to vector<8x16xf32>
    %179 = arith.select %177, %33, %178 : vector<8x16xi1>, vector<8x16xf32>
    %cst_55 = arith.constant dense<0.000000e+00> : vector<8xf32>
    %180 = vector.multi_reduction <add>, %179, %cst_55 [1] : vector<8x16xf32> to vector<8xf32>
    %181 = vector.shape_cast %180 : vector<8xf32> to vector<8x1xf32>
    %c8_i32 = arith.constant 8 : i32
    %182 = vector.broadcast %c8_i32 : i32 to vector<1x10xi32>
    %183 = arith.cmpi eq, %34, %182 : vector<1x10xi32>
    %cst_56 = arith.constant 0.000000e+00 : f32
    %184 = vector.shape_cast %183 : vector<1x10xi1> to vector<1x10xi1>
    %185 = vector.broadcast %184 : vector<1x10xi1> to vector<8x10xi1>
    %186 = vector.shape_cast %181 : vector<8x1xf32> to vector<8x1xf32>
    %187 = vector.broadcast %186 : vector<8x1xf32> to vector<8x10xf32>
    %188 = vector.broadcast %cst_56 : f32 to vector<8x10xf32>
    %189 = arith.select %185, %187, %188 : vector<8x10xi1>, vector<8x10xf32>
    %190 = arith.addf %173, %189 : vector<8x10xf32>
    %cst_57 = arith.constant 0.000000e+00 : f32
    %191 = vector.broadcast %cst_57 : f32 to vector<8x16xf32>
    %192 = arith.select %175, %33, %191 : vector<8x16xi1>, vector<8x16xf32>
    %cst_58 = arith.constant dense<0.000000e+00> : vector<8xf32>
    %193 = vector.multi_reduction <add>, %192, %cst_58 [1] : vector<8x16xf32> to vector<8xf32>
    %194 = vector.shape_cast %193 : vector<8xf32> to vector<8x1xf32>
    %c9_i32 = arith.constant 9 : i32
    %195 = vector.broadcast %c9_i32 : i32 to vector<1x10xi32>
    %196 = arith.cmpi eq, %34, %195 : vector<1x10xi32>
    %cst_59 = arith.constant 0.000000e+00 : f32
    %197 = vector.shape_cast %196 : vector<1x10xi1> to vector<1x10xi1>
    %198 = vector.broadcast %197 : vector<1x10xi1> to vector<8x10xi1>
    %199 = vector.shape_cast %194 : vector<8x1xf32> to vector<8x1xf32>
    %200 = vector.broadcast %199 : vector<8x1xf32> to vector<8x10xf32>
    %201 = vector.broadcast %cst_59 : f32 to vector<8x10xf32>
    %202 = arith.select %198, %200, %201 : vector<8x10xi1>, vector<8x10xf32>
    %203 = arith.addf %190, %202 : vector<8x10xf32>
    %c0_60 = arith.constant 0 : index
    %c0_61 = arith.constant 0 : index
    %204 = vector.load %arg5[%c0_60, %c0_61] : memref<8x10xf32, #tpu.memory_space<vmem>>, vector<8x10xf32>
    %205 = arith.addf %204, %203 : vector<8x10xf32>
    %c0_62 = arith.constant 0 : index
    %c0_63 = arith.constant 0 : index
    %206 = vector.load %arg5[%c0_62, %c0_63] : memref<8x10xf32, #tpu.memory_space<vmem>>, vector<8x10xf32>
    tpu.vector_store %arg5[%c0_62, %c0_63], %205 {strides = array<i32>} : memref<8x10xf32, #tpu.memory_space<vmem>>, vector<8x10xf32>,
    %c0_i32_64 = arith.constant 0 : i32
    %207 = arith.cmpi eq, %arg1, %c0_i32_64 : i32
    %208 = arith.extui %207 : i1 to i32
    %c0_i32_65 = arith.constant 0 : i32
    %209 = arith.cmpi ne, %208, %c0_i32_65 : i32
    scf.if %209 {
      %c0_66 = arith.constant 0 : index
      %c0_67 = arith.constant 0 : index
      %210 = vector.load %arg5[%c0_66, %c0_67] : memref<8x10xf32, #tpu.memory_space<vmem>>, vector<8x10xf32>
      %211 = vector.shape_cast %210 : vector<8x10xf32> to vector<1x8x10xf32>
      %c0_68 = arith.constant 0 : index
      %c0_69 = arith.constant 0 : index
      %c0_70 = arith.constant 0 : index
      %212 = vector.load %arg4[%c0_68, %c0_69, %c0_70] : memref<1x8x10xf32, #tpu.memory_space<vmem>>, vector<1x8x10xf32>
      tpu.vector_store %arg4[%c0_68, %c0_69, %c0_70], %211 {strides = array<i32>} : memref<1x8x10xf32, #tpu.memory_space<vmem>>, vector<1x8x10xf32>,
    } else {
    }
    return
  }
  func.func @transform_0(%arg0: i32, %arg1: i32) -> (i32, i32) {
    %c1_i32 = arith.constant 1 : i32
    %0 = arith.muli %arg0, %c1_i32 : i32
    %1 = arith.addi %0, %arg1 : i32
    %c0_i32 = arith.constant 0 : i32
    %2 = arith.minsi %1, %c0_i32 : i32
    %c0_i32_0 = arith.constant 0 : i32
    %c0_i32_1 = arith.constant 0 : i32
    return %c0_i32_0, %2 : i32, i32
  }
  func.func @transform_1(%arg0: i32, %arg1: i32) -> (i32, i32) {
    %c1_i32 = arith.constant 1 : i32
    %0 = arith.muli %arg0, %c1_i32 : i32
    %1 = arith.addi %0, %arg1 : i32
    %c0_i32 = arith.constant 0 : i32
    %2 = arith.minsi %1, %c0_i32 : i32
    %c0_i32_0 = arith.constant 0 : i32
    %c0_i32_1 = arith.constant 0 : i32
    return %c0_i32_0, %2 : i32, i32
  }
  func.func @transform_2(%arg0: i32, %arg1: i32) -> (i32, i32, i32) {
    %c0_i32 = arith.constant 0 : i32
    %c0_i32_0 = arith.constant 0 : i32
    %c0_i32_1 = arith.constant 0 : i32
    return %arg0, %c0_i32, %c0_i32_0 : i32, i32, i32
  }
}

</mosaic_0001>

<bundles_post_ra>
// kernel: tpu_custom_call.1
= control target key start
LH: loop header
LB: loop body
LE: loop exit
PB: predicated region body
PF: predicated region fallthrough
CT: control target
= control target key end

     0   :  { %7 = vsyncpa [#allocation4], 0  ;;  %s409_s0 = inlined_call_operand.hbm [shape: f32[8,16], index: 0, kind: input, shape index: {}]   ;;  %s410_s1 = inlined_call_operand.vmem [shape: s32[1,16], index: 1, kind: input, shape index: {}]   ;;  %s411_s2 = inlined_call_operand.hbm [shape: f32[1,8,10], index: 2, kind: output, shape index: {}]  }
   0x1   :  { %8 = vsyncpa [#allocation5], 0  ;;  %s310_s9 = smov [#allocation3]   ;;  %s262_s13 = scalar_lea.hbm %s409_s0, 128 }
   0x2   :  { %s20_s10 = sshll.u32 %s310_s9, 4  ;;  %p263_p0 = scmp.ne.s32.totalorder %s409_s0, %s262_s13  ;;  %s21_s10 = int_to_ptr.vmem [resolvable:$true] %s20_s10 }
   0x3   :  { %p266_p1 = scmp.lt.u32.totalorder %s262_s13, %s409_s0 }
   0x5   :  { %p268_p2 = pnand %p266_p1, %p263_p0 }
   0x7   :  { %271 = shalt.err (!%p268_p2)
}
   0x8   :  { %s272_s18 = scalar_lea.vmem %s21_s10, 128  ;;  %p277_p4 = scmp.lt.s32.totalorder %s21_s10, %s21_s10 }
   0x9   :  { %p273_p3 = scmp.ne.s32.totalorder %s21_s10, %s272_s18  ;;  %p278_p5 = scmp.lt.s32.totalorder %s272_s18, %s272_s18 }
   0xb   :  { %p279_p6 = por %p278_p5, %p277_p4 }
   0xd   :  { %p280_p7 = pnand %p279_p6, %p273_p3 }
   0xf   :  { %283 = shalt.err (!%p280_p7)
}
  0x10   :  { %23 = dma.hbm_to_vmem [thread:$0]  %s409_s0, 128, %s21_s10, [#allocation4]  }
  0x11   :  { %306 = dma.done.wait [#allocation4], 128  }
  0x12   :  { %307 = vsyncadd [#allocation4], 4294967168  ;;  %vm64_vm0 = vcmask 130048   ;;  %v62_v0 = vld [vmem:[#allocation3] sm:$0xff]  ;;  %v85_v18 = vlaneseq  ;;  %v252_v20 = vld [vmem:[%s410_s1] ss:$0 sm:$0xff] }
  0x13   :  { %v65_v1 = vsel %vm64_vm0, %v62_v0, -inf  ;;  %v311_v23 = vmov 0.0   ;;  %vm312_vm5 = vmmov 1   ;;  %s313_s1 = smov [#allocation6]  }
  0x14   :  { %v66_v2 = vrot.slane %v65_v1, 4  ;;  %v86_v19 = vshrl.u32 %v85_v18, 7  ;;  %v346_v21 = vand.u32 127, %v85_v18  ;;  %s238_s22 = sshll.u32 %s313_s1, 4  ;;  %s239_s22 = int_to_ptr.vmem [resolvable:$true] %s238_s22 }
  0x15   :  { %s284_s23 = scalar_lea.vmem %s239_s22, 128  ;;  %p289_p9 = scmp.lt.s32.totalorder %s239_s22, %s239_s22 }
  0x16   :  { %v67_v3 = vmax.f32 %v65_v1, %v66_v2  ;;  %vm91_vm1 = vcmp.eq.s32.totalorder %v252_v20, %v86_v19  ;;  %vm100_vm2 = vcmp.lt.s32.totalorder %v346_v21, 16  ;;  %p285_p8 = scmp.ne.s32.totalorder %s239_s22, %s284_s23  ;;  %p290_p10 = scmp.lt.s32.totalorder %s284_s23, %s284_s23 }
  0x17   :  { %v253_v24 = vsel %vm91_vm1, 1.0, %v311_v23 }
  0x18   :  { %v68_v4 = vrot.slane %v67_v3, 2  ;;  %p291_p11 = por %p290_p10, %p289_p9 }
  0x1a   :  { %v69_v5 = vmax.f32 %v67_v3, %v68_v4  ;;  %p292_p12 = pnand %p291_p11, %p285_p8 }
  0x1c   :  { %v70_v6 = vrot.slane %v69_v5, 1 }
  0x1e   :  { %v71_v7 = vmax.f32 %v69_v5, %v70_v6 }
  0x20   :  { %v72_v8 = vsub.f32 %v62_v0, %v71_v7 }
  0x22   :  { %v73_v9 = vmul.f32 1.442695, %v72_v8 }
  0x24   :  { %258 = vpow2.f32 %v73_v9 }
  0x2e   :  { %v259_v10 = vpop.eup %258 }
  0x2f   :  { %v75_v11 = vsel %vm64_vm0, %v259_v10, 0.0 }
  0x30   :  { %v76_v12 = vrot.slane %v75_v11, 4 }
  0x32   :  { %v77_v13 = vadd.f32 %v76_v12, %v75_v11 }
  0x34   :  { %v78_v14 = vrot.slane %v77_v13, 2 }
  0x36   :  { %v79_v15 = vadd.f32 %v78_v14, %v77_v13 }
  0x38   :  { %v80_v16 = vrot.slane %v79_v15, 1 }
  0x3a   :  { %v81_v17 = vadd.f32 %v80_v16, %v79_v15 }
  0x3c   :  { %260 = vrcp.f32 %v81_v17 }
  0x46   :  { %v261_v22 = vpop.eup %260 }
  0x47   :  { %v84_v25 = vmul.f32 %v261_v22, %v259_v10 }
  0x49   :  { %v101_v26 = vsub.f32 %v84_v25, %v253_v24  ;;  %vm105_vm3 = vcmp.gt.f32.partialorder %v84_v25, 0.0  ;;  %vm106_vm4 = vcmp.gt.f32.partialorder %v84_v25, 0.1  ;;  %vm118_vm7 = vcmp.gt.f32.partialorder %v84_v25, 0.2 }
  0x4a   :  { %vm107_vm6 = vmxor %vm106_vm4, %vm312_vm5  ;;  %vm130_vm8 = vcmp.gt.f32.partialorder %v84_v25, 0.3  ;;  %vm142_vm12 = vcmp.gt.f32.partialorder %v84_v25, 0.4  ;;  %vm154_vm15 = vcmp.gt.f32.partialorder %v84_v25, 0.5 }
  0x4b   :  { %v104_v27 = vsel %vm100_vm2, %v101_v26, 0.0  ;;  %vm108_vm9 = vmand %vm105_vm3, %vm107_vm6  ;;  %vm166_vm3 = vcmp.gt.f32.partialorder %v84_v25, 0.6 }
  0x4c   :  { %v109_v28 = vsel %vm108_vm9, %v104_v27, 0.0  ;;  %vm131_vm10 = vmxor %vm130_vm8, %vm312_vm5 }
  0x4d   :  { %v110_v29 = vsel %vm64_vm0, %v109_v28, 0.0  ;;  %vm132_vm11 = vmand %vm118_vm7, %vm131_vm10  ;;  %vm190_vm10 = vcmp.gt.f32.partialorder %v84_v25, 0.8 }
  0x4e   :  { %111 = vadd.xlane.f32.xlu0 %v110_v29  ;;  %v133_v30 = vsel %vm132_vm11, %v104_v27, 0.0  ;;  %vm119_vm13 = vmxor %vm118_vm7, %vm312_vm5  ;;  %vm178_vm7 = vcmp.gt.f32.partialorder %v84_v25, 0.7 }
  0x4f   :  { %v134_v31 = vsel %vm64_vm0, %v133_v30, 0.0  ;;  %vm120_vm14 = vmand %vm106_vm4, %vm119_vm13  ;;  %vm202_vm13 = vcmp.gt.f32.partialorder %v84_v25, 0.9 }
  0x50   :  { %135 = vadd.xlane.f32.xlu1 %v134_v31  ;;  %v121_v32 = vsel %vm120_vm14, %v104_v27, 0.0  ;;  %vm143_vm1 = vmxor %vm142_vm12, %vm312_vm5  ;;  %v214_v43 = vsel %vm202_vm13, %v104_v27, 0.0 }
  0x51   :  { %v122_v33 = vsel %vm64_vm0, %v121_v32, 0.0  ;;  %vm144_vm2 = vmand %vm130_vm8, %vm143_vm1  ;;  %v215_v47 = vsel %vm64_vm0, %v214_v43, 0.0 }
  0x52   :  { %123 = vadd.xlane.f32.xlu0 %v122_v33  ;;  %v145_v34 = vsel %vm144_vm2, %v104_v27, 0.0  ;;  %vm155_vm6 = vmxor %vm154_vm15, %vm312_vm5 }
  0x53   :  { %v146_v35 = vsel %vm64_vm0, %v145_v34, 0.0  ;;  %vm156_vm4 = vmand %vm142_vm12, %vm155_vm6  ;;  %vm125_vm6 = vcmp.eq.s32.totalorder %v346_v21, 1 }
  0x54   :  { %147 = vadd.xlane.f32.xlu1 %v146_v35  ;;  %v157_v36 = vsel %vm156_vm4, %v104_v27, 0.0  ;;  %vm167_vm9 = vmxor %vm166_vm3, %vm312_vm5  ;;  %vm137_vm4 = vcmp.eq.s32.totalorder %v346_v21, 2 }
  0x55   :  { %v158_v37 = vsel %vm64_vm0, %v157_v36, 0.0  ;;  %vm168_vm8 = vmand %vm154_vm15, %vm167_vm9  ;;  %vm173_vm9 = vcmp.eq.s32.totalorder %v346_v21, 5 }
  0x56   :  { %159 = vadd.xlane.f32.xlu0 %v158_v37  ;;  %v169_v38 = vsel %vm168_vm8, %v104_v27, 0.0  ;;  %vm179_vm11 = vmxor %vm178_vm7, %vm312_vm5  ;;  %vm185_vm8 = vcmp.eq.s32.totalorder %v346_v21, 6 }
  0x57   :  { %v170_v39 = vsel %vm64_vm0, %v169_v38, 0.0  ;;  %vm180_vm12 = vmand %vm166_vm3, %vm179_vm11  ;;  %vm60_vm3 = vcmask 80896   ;;  %vm209_vm11 = vcmp.eq.s32.totalorder %v346_v21, 8 }
  0x58   :  { %171 = vadd.xlane.f32.xlu1 %v170_v39  ;;  %v181_v40 = vsel %vm180_vm12, %v104_v27, 0.0  ;;  %vm191_vm14 = vmxor %vm190_vm10, %vm312_vm5  ;;  %61 = vst.msk [vmem:[#allocation2] sm:$0xff] %vm60_vm3, %v311_v23  ;;  %vm218_vm12 = vcmp.eq.s32.totalorder %v346_v21, 9 }
  0x59   :  { %v182_v41 = vsel %vm64_vm0, %v181_v40, 0.0  ;;  %vm192_vm15 = vmand %vm178_vm7, %vm191_vm14  ;;  %vm149_vm7 = vcmp.eq.s32.totalorder %v346_v21, 3 }
  0x5a   :  { %183 = vadd.xlane.f32.xlu0 %v182_v41  ;;  %v193_v42 = vsel %vm192_vm15, %v104_v27, 0.0  ;;  %vm203_vm1 = vmxor %vm202_vm13, %vm312_vm5  ;;  %vm113_vm5 = vcmp.eq.s32.totalorder %v346_v21, 0 }
  0x5b   :  { %v194_v44 = vsel %vm64_vm0, %v193_v42, 0.0  ;;  %vm204_vm2 = vmand %vm190_vm10, %vm203_vm1  ;;  %vm197_vm10 = vcmp.eq.s32.totalorder %v346_v21, 7 }
  0x5c   :  { %195 = vadd.xlane.f32.xlu1 %v194_v44  ;;  %v205_v45 = vsel %vm204_vm2, %v104_v27, 0.0 }
  0x5d   :  { %v206_v46 = vsel %vm64_vm0, %v205_v45, 0.0  ;;  %vm161_vm0 = vcmp.eq.s32.totalorder %v346_v21, 4 }
  0x5e   :  { %207 = vadd.xlane.f32.xlu0 %v206_v46 }
  0x5f   :  { %v223_v12 = vld [vmem:[#allocation2] sm:$0xff] }
  0x60   :  { %216 = vadd.xlane.f32.xlu1 %v215_v47 }
  0xdb   :  { %v112_v48 = vpop.xlane.xlu0 %111 }
  0xdc   :  { %v116_v51 = vsel %vm113_vm5, %v112_v48, 0.0 }
  0xdd   :  { %v136_v49 = vpop.xlane.xlu1 %135 }
  0xde   :  { %v140_v55 = vsel %vm137_vm4, %v136_v49, 0.0 }
  0xdf   :  { %v124_v50 = vpop.xlane.xlu0 %123 }
  0xe0   :  { %v128_v52 = vsel %vm125_vm6, %v124_v50, 0.0 }
  0xe1   :  { %v129_v53 = vadd.f32 %v128_v52, %v116_v51  ;;  %v148_v54 = vpop.xlane.xlu1 %147 }
  0xe2   :  { %v152_v56 = vsel %vm149_vm7, %v148_v54, 0.0 }
  0xe3   :  { %v141_v57 = vadd.f32 %v140_v55, %v129_v53  ;;  %v160_v58 = vpop.xlane.xlu0 %159 }
  0xe4   :  { %v164_v59 = vsel %vm161_vm0, %v160_v58, 0.0 }
  0xe5   :  { %v153_v60 = vadd.f32 %v152_v56, %v141_v57  ;;  %v172_v61 = vpop.xlane.xlu1 %171 }
  0xe6   :  { %v176_v62 = vsel %vm173_vm9, %v172_v61, 0.0 }
  0xe7   :  { %v165_v63 = vadd.f32 %v164_v59, %v153_v60  ;;  %v184_v0 = vpop.xlane.xlu0 %183 }
  0xe8   :  { %v188_v1 = vsel %vm185_vm8, %v184_v0, 0.0 }
  0xe9   :  { %v177_v2 = vadd.f32 %v176_v62, %v165_v63  ;;  %v196_v3 = vpop.xlane.xlu1 %195 }
  0xea   :  { %v200_v4 = vsel %vm197_vm10, %v196_v3, 0.0 }
  0xeb   :  { %v189_v5 = vadd.f32 %v188_v1, %v177_v2  ;;  %v208_v6 = vpop.xlane.xlu0 %207 }
  0xec   :  { %v212_v7 = vsel %vm209_vm11, %v208_v6, 0.0 }
  0xed   :  { %v201_v8 = vadd.f32 %v200_v4, %v189_v5  ;;  %v217_v9 = vpop.xlane.xlu1 %216 }
  0xee   :  { %v221_v10 = vsel %vm218_vm12, %v217_v9, 0.0 }
  0xef   :  { %v213_v11 = vadd.f32 %v212_v7, %v201_v8 }
  0xf1   :  { %v222_v13 = vadd.f32 %v221_v10, %v213_v11 }
  0xf3   :  { %v224_v14 = vadd.f32 %v223_v12, %v222_v13 }
  0xf5   :  { %226 = vst.msk [vmem:[#allocation2] sm:$0xff] %vm60_vm3, %v224_v14 }
  0xfc   :  { %v230_v15 = vld [vmem:[#allocation2] sm:$0xff] }
  0xfd   :  { %231 = vst.msk [vmem:[#allocation6] sm:$0xff] %vm60_vm3, %v230_v15 }
  0xfe   :  { %295 = shalt.err (!%p292_p12)
}
  0xff   :  { %s296_s26 = scalar_lea.hbm %s411_s2, 128 }
 0x100   :  { %p297_p13 = scmp.ne.s32.totalorder %s411_s2, %s296_s26  ;;  %p300_p0 = scmp.lt.u32.totalorder %s296_s26, %s411_s2 }
 0x102   :  { %p302_p1 = pnand %p300_p0, %p297_p13 }
 0x104   :  { %305 = shalt.err (!%p302_p1)
}
 0x105   :  { %241 = dma.vmem_to_hbm [thread:$0]  %s239_s22, 128, %s411_s2, [#allocation5]  }
 0x106   :  { %308 = dma.done.wait [#allocation5], 128  }
 0x107   :  { %309 = vsyncadd [#allocation5], 4294967168 }
 0x108   :  { %245 = vsyncpa [#allocation4], 1 }
 0x109   :  { %246 = vsyncpa [#allocation5], 1 }

</bundles_post_ra>
